<compile_context>
chip_gen: v6e
topology: v6e:2x2x1
jax: 0.10.0
libtpu: 0.0.40
codegen_flags: <defaults>
</compile_context>

<pallas_src>
import functools

import jax
import jax.numpy as jnp
from jax.experimental import pallas as pl
from jax.experimental.pallas import tpu as pltpu


def ffnn_sigmoid_kernel(x_ref, w1_ref, b1_ref, w2_ref, b2_ref, o_ref, acc_ref):
    k = pl.program_id(1)

    @pl.when(k == 0)
    def _():
        acc_ref[...] = jnp.zeros_like(acc_ref)

    # fc1 chunk: (tb, in_p) @ (in_p, tk) + (1, tk).  bf16 MXU feeds, f32 acc.
    h = jnp.dot(x_ref[...], w1_ref[...], preferred_element_type=jnp.float32)
    h = h + b1_ref[...]                      # broadcast (1, tk) over rows
    # sigmoid(h) = 0.5 * (tanh(h/2) + 1): single EUP push per element; the
    # mul/add are VALU filler hidden under the MXU.
    s = 0.5 * (jnp.tanh(0.5 * h) + 1.0)
    # fc2 partial: accumulate this hidden chunk's contribution to the output.
    acc_ref[...] += jnp.dot(s.astype(jnp.bfloat16), w2_ref[...],
                            preferred_element_type=jnp.float32)

    @pl.when(k == pl.num_programs(1) - 1)
    def _():
        o_ref[...] = (acc_ref[...] + b2_ref[...]).astype(o_ref.dtype)


def _round_up(n, m):
    return ((n + m - 1) // m) * m


@functools.partial(jax.jit, static_argnames=("block_b", "block_k"))
def ffnn_sigmoid(x, w1, b1, w2, b2, *, block_b=256, block_k=512):
    """sigmoid(x @ w1 + b1) @ w2 + b2 (PyTorch Linear with W pre-transposed).

    x: (B, input_dim); w1: (input_dim, hidden); b1: (hidden,);
    w2: (hidden, output); b2: (output,).  Returns (B, output) in f32.
    """
    B, in_dim = x.shape
    hid = w1.shape[1]
    out_dim = w2.shape[1]

    LANE = 128

    # Lane-dense padding of every contraction / output dim (exact, see header).
    in_p = _round_up(in_dim, LANE)
    out_p = _round_up(out_dim, LANE)
    hid_p = _round_up(hid, LANE)
    tk = min(_round_up(block_k, LANE), hid_p)      # hidden chunk
    hid_p = _round_up(hid_p, tk)
    n_k = hid_p // tk

    # Batch tile: full MXU M pass (128).  For B > 128 make sure the parallel
    # batch axis has >= 2 grid steps so both v7x TensorCores engage.
    tb = min(_round_up(block_b, LANE), _round_up(B, LANE))
    if B > LANE and _round_up(B, tb) == tb:
        tb = _round_up((B + 1) // 2, LANE)
    b_p = _round_up(B, tb)
    n_b = b_p // tb

    x_p = jnp.pad(x, ((0, b_p - B), (0, in_p - in_dim))).astype(jnp.bfloat16)
    w1_p = jnp.pad(w1, ((0, in_p - in_dim), (0, hid_p - hid))).astype(jnp.bfloat16)
    b1_p = jnp.pad(b1, (0, hid_p - hid)).reshape(1, hid_p).astype(jnp.float32)
    w2_p = jnp.pad(w2, ((0, hid_p - hid), (0, out_p - out_dim))).astype(jnp.bfloat16)
    b2_p = jnp.pad(b2, (0, out_p - out_dim)).reshape(1, out_p).astype(jnp.float32)

    # Explicit VMEM budget: actual double-buffered tile footprint + headroom,
    # clamped under v7x's 64 MiB physical VMEM (v5e/v6e have more).
    dbl = 2
    vmem_need = (
        dbl * tb * in_p * 2          # x tile (bf16)
        + dbl * in_p * tk * 2        # w1 chunk (bf16)
        + dbl * 8 * tk * 4           # b1 chunk (f32, sublane-padded)
        + dbl * tk * out_p * 2       # w2 chunk (bf16)
        + dbl * 8 * out_p * 4        # b2 (f32)
        + dbl * tb * out_p * 4       # out tile (f32)
        + tb * out_p * 4             # accumulator scratch
        + 2 * tb * tk * 4            # h / sigmoid intermediate slack
    )
    vmem_limit = min(max(int(vmem_need * 1.5) + (4 << 20), 32 << 20), 64 << 20)

    flops = 2 * b_p * hid_p * (in_p + out_p)
    bytes_accessed = (x_p.size * 2 + w1_p.size * 2 + b1_p.size * 4
                      + w2_p.size * 2 + b2_p.size * 4 + b_p * out_p * 4)

    out = pl.pallas_call(
        ffnn_sigmoid_kernel,
        out_shape=jax.ShapeDtypeStruct((b_p, out_p), jnp.float32),
        grid_spec=pltpu.PrefetchScalarGridSpec(
            num_scalar_prefetch=0,
            grid=(n_b, n_k),
            in_specs=[
                # x: streamed per batch tile, constant across the hidden axis
                # (re-DMA'd only at batch-tile boundaries).
                pl.BlockSpec((tb, in_p), lambda i, k: (i, 0)),
                # w1 / b1 / w2: chunked over the hidden axis (double-buffered).
                pl.BlockSpec((in_p, tk), lambda i, k: (0, k)),
                pl.BlockSpec((1, tk), lambda i, k: (0, k)),
                pl.BlockSpec((tk, out_p), lambda i, k: (k, 0)),
                # b2: single constant (tiny) block.
                pl.BlockSpec((1, out_p), lambda i, k: (0, 0)),
            ],
            out_specs=pl.BlockSpec((tb, out_p), lambda i, k: (i, 0)),
            scratch_shapes=[pltpu.VMEM((tb, out_p), jnp.float32)],
        ),
        compiler_params=pltpu.CompilerParams(
            # Batch tiles independent (megacore-shardable on v7x); hidden
            # chunks are a reduction -> arbitrary, last in the grid.
            dimension_semantics=("parallel", "arbitrary"),
            vmem_limit_bytes=vmem_limit,
        ),
        cost_estimate=pl.CostEstimate(
            flops=flops,
            transcendentals=b_p * hid_p,    # one tanh per hidden element
            bytes_accessed=bytes_accessed,
        ),
    )(x_p, w1_p, b1_p, w2_p, b2_p)

    # TODO(synk): for very large output_dim, also tile w2/out over out_p
    # columns (extra parallel grid axis) to bound the w2 chunk and out tile.
    return out[:B, :out_dim]


if __name__ == "__main__":
    # Small shapes implied by the module: input_dim=16, hidden_dim=32, output_dim=8
    batch, input_dim, hidden_dim, output_dim = 8, 16, 32, 8

    key = jax.random.PRNGKey(0)
    kx, kw1, kb1, kw2, kb2 = jax.random.split(key, 5)

    x = jax.random.normal(kx, (batch, input_dim), dtype=jnp.float32)

    # Deterministic param init (uniform like PyTorch Linear default, fixed seed).
    bound1 = 1.0 / (input_dim ** 0.5)
    w1 = jax.random.uniform(kw1, (input_dim, hidden_dim), jnp.float32, -bound1, bound1)
    b1 = jax.random.uniform(kb1, (hidden_dim,), jnp.float32, -bound1, bound1)
    bound2 = 1.0 / (hidden_dim ** 0.5)
    w2 = jax.random.uniform(kw2, (hidden_dim, output_dim), jnp.float32, -bound2, bound2)
    b2 = jax.random.uniform(kb2, (output_dim,), jnp.float32, -bound2, bound2)

    out = ffnn_sigmoid(x, w1, b1, w2, b2)
    jax.block_until_ready(out)

    # Pure-JAX f32 reference check (tolerance covers bf16 MXU inputs with f32
    # accumulation; tanh-based sigmoid is exact up to EUP precision).
    ref = jax.nn.sigmoid(x @ w1 + b1) @ w2 + b2
    assert out.shape == (batch, output_dim)
    assert jnp.allclose(out, ref, atol=2e-2, rtol=2e-2), \
        f"max abs err {jnp.max(jnp.abs(out - ref))}"

    print("KERNEL_OK")
</pallas_src>

<mosaic_0001>
module attributes {stable_mosaic.version = 11 : i64} {
  func.func @ffnn_sigmoid_kernel(%arg0: i32, %arg1: i32, %arg2: memref<128x128xbf16, #tpu.memory_space<vmem>>, %arg3: memref<128x128xbf16, #tpu.memory_space<vmem>>, %arg4: memref<1x128xf32, #tpu.memory_space<vmem>>, %arg5: memref<128x128xbf16, #tpu.memory_space<vmem>>, %arg6: memref<1x128xf32, #tpu.memory_space<vmem>>, %arg7: memref<128x128xf32, #tpu.memory_space<vmem>>, %arg8: memref<128x128xf32, #tpu.memory_space<vmem>>) attributes {dimension_semantics = [#tpu.dimension_semantics<parallel>, #tpu.dimension_semantics<arbitrary>], iteration_bounds = array<i64: 1, 1>, scalar_prefetch = 0 : i64, scratch_operands = 1 : i64, tpu.core_type = #tpu.core_type<tc>, window_params = [{transform_indices = @transform_0, window_bounds = array<i64: 128, 128>}, {transform_indices = @transform_1, window_bounds = array<i64: 128, 128>}, {transform_indices = @transform_2, window_bounds = array<i64: 1, 128>}, {transform_indices = @transform_3, window_bounds = array<i64: 128, 128>}, {pipeline_mode = #tpu.pipeline_mode<synchronous>, transform_indices = @transform_4, window_bounds = array<i64: 1, 128>}, {transform_indices = @transform_5, window_bounds = array<i64: 128, 128>}]} {
    %c0_i32 = arith.constant 0 : i32
    %0 = arith.cmpi eq, %arg1, %c0_i32 : i32
    %1 = arith.extui %0 : i1 to i32
    %c0_i32_0 = arith.constant 0 : i32
    %2 = arith.cmpi ne, %1, %c0_i32_0 : i32
    scf.if %2 {
      %cst_18 = arith.constant 0.000000e+00 : f32
      %25 = vector.broadcast %cst_18 : f32 to vector<128x128xf32>
      %c0_19 = arith.constant 0 : index
      %c0_20 = arith.constant 0 : index
      %26 = vector.load %arg8[%c0_19, %c0_20] : memref<128x128xf32, #tpu.memory_space<vmem>>, vector<128x128xf32>
      tpu.vector_store %arg8[%c0_19, %c0_20], %25 {strides = array<i32>} : memref<128x128xf32, #tpu.memory_space<vmem>>, vector<128x128xf32>,
    } else {
    }
    %c0 = arith.constant 0 : index
    %c0_1 = arith.constant 0 : index
    %3 = vector.load %arg2[%c0, %c0_1] : memref<128x128xbf16, #tpu.memory_space<vmem>>, vector<128x128xbf16>
    %c0_2 = arith.constant 0 : index
    %c0_3 = arith.constant 0 : index
    %4 = vector.load %arg3[%c0_2, %c0_3] : memref<128x128xbf16, #tpu.memory_space<vmem>>, vector<128x128xbf16>
    %cst = arith.constant dense<0.000000e+00> : vector<128x128xf32>
    %5 = tpu.matmul %3, %4, %cst {dimension_numbers = #tpu.dot_dimension_numbers<[1], [0], [0], [1], [0, 0, 1, 1], [], []>} : vector<128x128xbf16>, vector<128x128xbf16>, vector<128x128xf32> -> vector<128x128xf32>
    %c0_4 = arith.constant 0 : index
    %c0_5 = arith.constant 0 : index
    %6 = vector.load %arg4[%c0_4, %c0_5] : memref<1x128xf32, #tpu.memory_space<vmem>>, vector<1x128xf32>
    %7 = vector.broadcast %6 : vector<1x128xf32> to vector<128x128xf32>
    %8 = arith.addf %5, %7 : vector<128x128xf32>
    %cst_6 = arith.constant 5.000000e-01 : f32
    %9 = vector.broadcast %cst_6 : f32 to vector<128x128xf32>
    %10 = arith.mulf %9, %8 : vector<128x128xf32>
    %11 = math.tanh %10 : vector<128x128xf32>
    %cst_7 = arith.constant 1.000000e+00 : f32
    %12 = vector.broadcast %cst_7 : f32 to vector<128x128xf32>
    %13 = arith.addf %11, %12 : vector<128x128xf32>
    %cst_8 = arith.constant 5.000000e-01 : f32
    %14 = vector.broadcast %cst_8 : f32 to vector<128x128xf32>
    %15 = arith.mulf %14, %13 : vector<128x128xf32>
    %c0_9 = arith.constant 0 : index
    %c0_10 = arith.constant 0 : index
    %16 = vector.load %arg8[%c0_9, %c0_10] : memref<128x128xf32, #tpu.memory_space<vmem>>, vector<128x128xf32>
    %17 = arith.truncf %15 : vector<128x128xf32> to vector<128x128xbf16>
    %c0_11 = arith.constant 0 : index
    %c0_12 = arith.constant 0 : index
    %18 = vector.load %arg5[%c0_11, %c0_12] : memref<128x128xbf16, #tpu.memory_space<vmem>>, vector<128x128xbf16>
    %cst_13 = arith.constant dense<0.000000e+00> : vector<128x128xf32>
    %19 = tpu.matmul %17, %18, %cst_13 {dimension_numbers = #tpu.dot_dimension_numbers<[1], [0], [0], [1], [0, 0, 1, 1], [], []>} : vector<128x128xbf16>, vector<128x128xbf16>, vector<128x128xf32> -> vector<128x128xf32>
    %20 = arith.addf %16, %19 : vector<128x128xf32>
    %c0_14 = arith.constant 0 : index
    %c0_15 = arith.constant 0 : index
    %21 = vector.load %arg8[%c0_14, %c0_15] : memref<128x128xf32, #tpu.memory_space<vmem>>, vector<128x128xf32>
    tpu.vector_store %arg8[%c0_14, %c0_15], %20 {strides = array<i32>} : memref<128x128xf32, #tpu.memory_space<vmem>>, vector<128x128xf32>,
    %c0_i32_16 = arith.constant 0 : i32
    %22 = arith.cmpi eq, %arg1, %c0_i32_16 : i32
    %23 = arith.extui %22 : i1 to i32
    %c0_i32_17 = arith.constant 0 : i32
    %24 = arith.cmpi ne, %23, %c0_i32_17 : i32
    scf.if %24 {
      %c0_18 = arith.constant 0 : index
      %c0_19 = arith.constant 0 : index
      %25 = vector.load %arg8[%c0_18, %c0_19] : memref<128x128xf32, #tpu.memory_space<vmem>>, vector<128x128xf32>
      %c0_20 = arith.constant 0 : index
      %c0_21 = arith.constant 0 : index
      %26 = vector.load %arg6[%c0_20, %c0_21] : memref<1x128xf32, #tpu.memory_space<vmem>>, vector<1x128xf32>
      %27 = vector.broadcast %26 : vector<1x128xf32> to vector<128x128xf32>
      %28 = arith.addf %25, %27 : vector<128x128xf32>
      %c0_22 = arith.constant 0 : index
      %c0_23 = arith.constant 0 : index
      %29 = vector.load %arg7[%c0_22, %c0_23] : memref<128x128xf32, #tpu.memory_space<vmem>>, vector<128x128xf32>
      tpu.vector_store %arg7[%c0_22, %c0_23], %28 {strides = array<i32>} : memref<128x128xf32, #tpu.memory_space<vmem>>, vector<128x128xf32>,
    } else {
    }
    return
  }
  func.func @transform_0(%arg0: i32, %arg1: i32) -> (i32, i32) {
    %c0_i32 = arith.constant 0 : i32
    %c0_i32_0 = arith.constant 0 : i32
    return %arg0, %c0_i32 : i32, i32
  }
  func.func @transform_1(%arg0: i32, %arg1: i32) -> (i32, i32) {
    %c0_i32 = arith.constant 0 : i32
    %c0_i32_0 = arith.constant 0 : i32
    return %c0_i32, %arg1 : i32, i32
  }
  func.func @transform_2(%arg0: i32, %arg1: i32) -> (i32, i32) {
    %c0_i32 = arith.constant 0 : i32
    %c0_i32_0 = arith.constant 0 : i32
    return %c0_i32, %arg1 : i32, i32
  }
  func.func @transform_3(%arg0: i32, %arg1: i32) -> (i32, i32) {
    %c0_i32 = arith.constant 0 : i32
    %c0_i32_0 = arith.constant 0 : i32
    return %arg1, %c0_i32 : i32, i32
  }
  func.func @transform_4(%arg0: i32, %arg1: i32) -> (i32, i32) {
    %c0_i32 = arith.constant 0 : i32
    %c0_i32_0 = arith.constant 0 : i32
    %c0_i32_1 = arith.constant 0 : i32
    return %c0_i32, %c0_i32_0 : i32, i32
  }
  func.func @transform_5(%arg0: i32, %arg1: i32) -> (i32, i32) {
    %c0_i32 = arith.constant 0 : i32
    %c0_i32_0 = arith.constant 0 : i32
    return %arg0, %c0_i32 : i32, i32
  }
}

</mosaic_0001>

<bundles_post_ra>
// kernel: ffnn_sigmoid.1
= control target key start
LH: loop header
LB: loop body
LE: loop exit
PB: predicated region body
PF: predicated region fallthrough
CT: control target
= control target key end

     0   :  { %s968_s1 = inlined_call_operand.vmem [shape: bf16[128,128], index: 1, kind: input, shape index: {}]   ;;  %s969_s0 = inlined_call_operand.vmem [shape: bf16[128,128], index: 0, kind: input, shape index: {}]   ;;  %s970_s3 = inlined_call_operand.vmem [shape: bf16[128,128], index: 3, kind: input, shape index: {}]   ;;  %s971_s2 = inlined_call_operand.vmem [shape: f32[1,128], index: 2, kind: input, shape index: {}]   ;;  %s972_s4 = inlined_call_operand.vmem [shape: f32[1,128], index: 4, kind: input, shape index: {}]   ;;  %s973_s5 = inlined_call_operand.vmem [shape: f32[128,128], index: 5, kind: output, shape index: {}]  }
   0x1   :  { %v738_v0 = vld [vmem:[%s968_s1 + $0x38] sm:$0xff]   ;;  %v739_v1 = vld [vmem:[%s968_s1 + $0x30] sm:$0xff]   ;;  %v740_v2 = vld [vmem:[%s968_s1 + $0x28] sm:$0xff]  }
   0x2   :  { %674 = vmatprep.subr.bf16.mxu0 %v738_v0  ;;  %v741_v3 = vld [vmem:[%s968_s1 + $0x20] sm:$0xff]   ;;  %v742_v5 = vld [vmem:[%s968_s1 + $0x18] sm:$0xff]   ;;  %v743_v6 = vld [vmem:[%s968_s1 + $0x10] sm:$0xff]  }
   0x3   :  { %675 = vmatpush3.bf16.msra.mxu0 %v738_v0  ;;  %v746_v4 = vld [vmem:[%s969_s0] sm:$0xff]   ;;  %v744_v7 = vld [vmem:[%s968_s1 + $0x8] sm:$0xff]   ;;  %v748_v10 = vld [vmem:[%s969_s0 + $0x10] sm:$0xff]  }
   0x4   :  { %676 = vmatprep.subr.bf16.mxu0 %v739_v1  ;;  %690 = vmatprep.mubr.bf16.mxu0 %v746_v4  ;;  %v745_v8 = vld [vmem:[%s968_s1] sm:$0xff]   ;;  %v747_v9 = vld [vmem:[%s969_s0 + $0x8] sm:$0xff]   ;;  %v749_v11 = vld [vmem:[%s969_s0 + $0x18] sm:$0xff]  }
   0x5   :  { %v750_v12 = vld [vmem:[%s969_s0 + $0x20] sm:$0xff]   ;;  %v751_v13 = vld [vmem:[%s969_s0 + $0x28] sm:$0xff]   ;;  %v752_v14 = vld [vmem:[%s969_s0 + $0x30] sm:$0xff]  }
   0x6   :  { %v753_v15 = vld [vmem:[%s969_s0 + $0x38] sm:$0xff]   ;;  %v755_v17 = vld [vmem:[%s970_s3 + $0x30] sm:$0xff]   ;;  %v756_v18 = vld [vmem:[%s970_s3 + $0x28] sm:$0xff]  }
   0x7   :  { %677 = vmatpush3.bf16.msra.mxu0 %v739_v1  ;;  %v754_v16 = vld [vmem:[%s970_s3 + $0x38] sm:$0xff]   ;;  %v757_v19 = vld [vmem:[%s970_s3 + $0x20] sm:$0xff]   ;;  %v759_v21 = vld [vmem:[%s970_s3 + $0x10] sm:$0xff]  }
   0x8   :  { %678 = vmatprep.subr.bf16.mxu0 %v740_v2  ;;  %706 = vmatprep.subr.bf16.mxu1 %v754_v16  ;;  %v758_v20 = vld [vmem:[%s970_s3 + $0x18] sm:$0xff]   ;;  %v760_v22 = vld [vmem:[%s970_s3 + $0x8] sm:$0xff]   ;;  %v761_v23 = vld [vmem:[%s970_s3] sm:$0xff]  }
   0x9   :  { %707 = vmatpush3.bf16.msra.mxu1 %v754_v16  ;;  %v899_v24 = vld [vmem:[%s971_s2] ss:$0 sm:$0xff] }
   0xa   :  { %708 = vmatprep.subr.bf16.mxu1 %v755_v17 }
   0xb   :  { %679 = vmatpush3.bf16.msra.mxu0 %v740_v2 }
   0xc   :  { %680 = vmatprep.subr.bf16.mxu0 %v741_v3 }
   0xd   :  { %709 = vmatpush3.bf16.msra.mxu1 %v755_v17 }
   0xe   :  { %710 = vmatprep.subr.bf16.mxu1 %v756_v18 }
   0xf   :  { %681 = vmatpush3.bf16.msra.mxu0 %v741_v3 }
  0x10   :  { %682 = vmatprep.subr.bf16.mxu0 %v742_v5 }
  0x11   :  { %711 = vmatpush3.bf16.msra.mxu1 %v756_v18 }
  0x12   :  { %712 = vmatprep.subr.bf16.mxu1 %v757_v19 }
  0x13   :  { %683 = vmatpush3.bf16.msra.mxu0 %v742_v5 }
  0x14   :  { %684 = vmatprep.subr.bf16.mxu0 %v743_v6 }
  0x15   :  { %713 = vmatpush3.bf16.msra.mxu1 %v757_v19 }
  0x16   :  { %714 = vmatprep.subr.bf16.mxu1 %v758_v20 }
  0x17   :  { %685 = vmatpush3.bf16.msra.mxu0 %v743_v6 }
  0x18   :  { %686 = vmatprep.subr.bf16.mxu0 %v744_v7 }
  0x19   :  { %715 = vmatpush3.bf16.msra.mxu1 %v758_v20 }
  0x1a   :  { %716 = vmatprep.subr.bf16.mxu1 %v759_v21 }
  0x1b   :  { %687 = vmatpush3.bf16.msra.mxu0 %v744_v7 }
  0x1c   :  { %688 = vmatprep.subr.bf16.mxu0 %v745_v8 }
  0x1d   :  { %717 = vmatpush3.bf16.msra.mxu1 %v759_v21 }
  0x1e   :  { %718 = vmatprep.subr.bf16.mxu1 %v760_v22 }
  0x1f   :  { %689 = vmatpush3.bf16.msra.mxu0 %v745_v8 }
  0x21   :  { %719 = vmatpush3.bf16.msra.mxu1 %v760_v22 }
  0x22   :  { %691 = vmatmul.mubr.bf16.vlgmr.msra.gmra.mxu0 %v747_v9  ;;  %720 = vmatprep.subr.bf16.mxu1 %v761_v23 }
  0x23   :  { %694 = vmatprep.mubr.bf16.mxu0 %v748_v10 }
  0x25   :  { %721 = vmatpush3.bf16.msra.mxu1 %v761_v23 }
  0x2a   :  { %695 = vmatmul.mubr.bf16.gmra.mxu0 %v749_v11 }
  0x2b   :  { %698 = vmatprep.mubr.bf16.mxu0 %v750_v12 }
  0x32   :  { %699 = vmatmul.mubr.bf16.gmra.mxu0 %v751_v13 }
  0x33   :  { %702 = vmatprep.mubr.bf16.mxu0 %v752_v14 }
  0x3a   :  { %703 = vmatmul.mubr.bf16.gmra.mxu0 %v753_v15 }
  0xe2   :  { %v692_v25 = vpop.f32.mrf.mxu0 }
  0xe3   :  { %v219_v26 = vadd.f32 %v692_v25, %v899_v24 }
  0xe4   :  { %v210_v27 = vpop.f32.mrf.mxu0 }
  0xe5   :  { %v275_v28 = vmul.f32 0.5, %v219_v26  ;;  %v211_v29 = vadd.f32 %v899_v24, %v210_v27 }
  0xe6   :  { %v693_v30 = vpop.f32.mrf.mxu0 }
  0xe7   :  { %v273_v31 = vmul.f32 0.5, %v211_v29  ;;  %v222_v32 = vadd.f32 %v693_v30, %v899_v24  ;;  %762 = vtanh.f32 %v275_v28 }
  0xe8   :  { %v213_v33 = vpop.f32.mrf.mxu0 }
  0xe9   :  { %v276_v34 = vmul.f32 0.5, %v222_v32  ;;  %v214_v35 = vadd.f32 %v899_v24, %v213_v33  ;;  %764 = vtanh.f32 %v273_v31 }
  0xea   :  { %v696_v36 = vpop.f32.mrf.mxu0 }
  0xeb   :  { %766 = vtanh.f32 %v276_v34  ;;  %v274_v37 = vmul.f32 0.5, %v214_v35  ;;  %v235_v38 = vadd.f32 %v696_v36, %v899_v24 }
  0xec   :  { %v226_v39 = vpop.f32.mrf.mxu0 }
  0xed   :  { %768 = vtanh.f32 %v274_v37  ;;  %v227_v40 = vadd.f32 %v899_v24, %v226_v39  ;;  %v279_v41 = vmul.f32 0.5, %v235_v38 }
  0xee   :  { %v697_v42 = vpop.f32.mrf.mxu0 }
  0xef   :  { %v277_v43 = vmul.f32 0.5, %v227_v40  ;;  %v238_v44 = vadd.f32 %v697_v42, %v899_v24 }
  0xf0   :  { %v229_v45 = vpop.f32.mrf.mxu0 }
  0xf1   :  { %770 = vtanh.f32 %v277_v43  ;;  %v280_v46 = vmul.f32 0.5, %v238_v44  ;;  %v230_v47 = vadd.f32 %v899_v24, %v229_v45 }
  0xf2   :  { %772 = vtanh.f32 %v279_v41  ;;  %v700_v48 = vpop.f32.mrf.mxu0 }
  0xf3   :  { %774 = vtanh.f32 %v280_v46  ;;  %v278_v49 = vmul.f32 0.5, %v230_v47  ;;  %v251_v50 = vadd.f32 %v700_v48, %v899_v24 }
  0xf4   :  { %v242_v51 = vpop.f32.mrf.mxu0  ;;  %v763_v53 = vpop.eup %762 }
  0xf5   :  { %776 = vtanh.f32 %v278_v49  ;;  %v243_v52 = vadd.f32 %v899_v24, %v242_v51  ;;  %v283_v54 = vmul.f32 0.5, %v251_v50  ;;  %v307_v1 = vadd.f32 1.0, %v763_v53 }
  0xf6   :  { %v701_v55 = vpop.f32.mrf.mxu0  ;;  %v765_v56 = vpop.eup %764 }
  0xf7   :  { %v281_v57 = vmul.f32 0.5, %v243_v52  ;;  %v254_v58 = vadd.f32 %v701_v55, %v899_v24  ;;  %v305_v3 = vadd.f32 1.0, %v765_v56  ;;  %v323_v11 = vmul.f32 0.5, %v307_v1  ;;  %v641_v1 = vld [vmem:[%s972_s4] ss:$0 sm:$0xff] }
  0xf8   :  { %v767_v59 = vpop.eup %766  ;;  %v245_v60 = vpop.f32.mrf.mxu0 }
  0xf9   :  { %v308_v61 = vadd.f32 1.0, %v767_v59  ;;  %778 = vtanh.f32 %v281_v57  ;;  %v284_v62 = vmul.f32 0.5, %v254_v58  ;;  %v246_v63 = vadd.f32 %v899_v24, %v245_v60 }
  0xfa   :  { %v769_v0 = vpop.eup %768  ;;  %780 = vtanh.f32 %v283_v54  ;;  %v704_v2 = vpop.f32.mrf.mxu0  ;;  %v321_v13 = vmul.f32 0.5, %v305_v3 }
  0xfb   :  { %782 = vtanh.f32 %v284_v62  ;;  %v282_v4 = vmul.f32 0.5, %v246_v63  ;;  %v267_v5 = vadd.f32 %v704_v2, %v899_v24  ;;  %v324_v6 = vmul.f32 0.5, %v308_v61 }
  0xfc   :  { %v258_v7 = vpop.f32.mrf.mxu0  ;;  %v306_v8 = vadd.f32 1.0, %v769_v0 }
  0xfd   :  { %784 = vtanh.f32 %v282_v4  ;;  %v259_v9 = vadd.f32 %v899_v24, %v258_v7  ;;  %v287_v16 = vmul.f32 0.5, %v267_v5  ;;  %v354_v22 = vpack.c.bf16 %v324_v6, %v323_v11 }
  0xfe   :  { %v771_v10 = vpop.eup %770  ;;  %v705_v12 = vpop.f32.mrf.mxu0  ;;  %v322_v14 = vmul.f32 0.5, %v306_v8 }
  0xff   :  { %v773_v15 = vpop.eup %772  ;;  %v285_v17 = vmul.f32 0.5, %v259_v9  ;;  %v270_v19 = vadd.f32 %v705_v12, %v899_v24  ;;  %v309_v23 = vadd.f32 1.0, %v771_v10 }
 0x100   :  { %v775_v18 = vpop.eup %774  ;;  %v261_v20 = vpop.f32.mrf.mxu0  ;;  %v353_v21 = vpack.c.bf16 %v322_v14, %v321_v13  ;;  %v311_v29 = vadd.f32 1.0, %v773_v15 }
 0x101   :  { %v312_v25 = vadd.f32 1.0, %v775_v18  ;;  %786 = vtanh.f32 %v285_v17  ;;  %v262_v26 = vadd.f32 %v899_v24, %v261_v20  ;;  %v288_v28 = vmul.f32 0.5, %v270_v19 }
 0x102   :  { %v777_v27 = vpop.eup %776  ;;  %722 = vmatprep.mubr.bf16.mxu1 %v353_v21  ;;  %788 = vtanh.f32 %v287_v16  ;;  %v325_v32 = vmul.f32 0.5, %v309_v23  ;;  %v327_v37 = vmul.f32 0.5, %v311_v29 }
 0x103   :  { %v310_v30 = vadd.f32 1.0, %v777_v27  ;;  %v286_v31 = vmul.f32 0.5, %v262_v26  ;;  %723 = vmatmul.mubr.bf16.vlgmr.msra.gmra.mxu1 %v354_v22  ;;  %790 = vtanh.f32 %v288_v28  ;;  %v328_v33 = vmul.f32 0.5, %v312_v25 }
 0x105   :  { %v326_v34 = vmul.f32 0.5, %v310_v30  ;;  %792 = vtanh.f32 %v286_v31  ;;  %v356_v41 = vpack.c.bf16 %v328_v33, %v327_v37 }
 0x106   :  { %v779_v35 = vpop.eup %778 }
 0x107   :  { %v781_v36 = vpop.eup %780  ;;  %v355_v38 = vpack.c.bf16 %v326_v34, %v325_v32  ;;  %v313_v40 = vadd.f32 1.0, %v779_v35 }
 0x108   :  { %v783_v39 = vpop.eup %782  ;;  %v315_v43 = vadd.f32 1.0, %v781_v36 }
 0x109   :  { %v316_v24 = vadd.f32 1.0, %v783_v39  ;;  %726 = vmatprep.mubr.bf16.mxu1 %v355_v38  ;;  %v329_v45 = vmul.f32 0.5, %v313_v40 }
 0x10a   :  { %v785_v42 = vpop.eup %784  ;;  %v331_v49 = vmul.f32 0.5, %v315_v43 }
 0x10b   :  { %v314_v44 = vadd.f32 1.0, %v785_v42  ;;  %727 = vmatmul.mubr.bf16.gmra.mxu1 %v356_v41  ;;  %v332_v46 = vmul.f32 0.5, %v316_v24 }
 0x10d   :  { %v330_v47 = vmul.f32 0.5, %v314_v44  ;;  %v358_v54 = vpack.c.bf16 %v332_v46, %v331_v49 }
 0x10e   :  { %v787_v48 = vpop.eup %786 }
 0x10f   :  { %v357_v50 = vpack.c.bf16 %v330_v47, %v329_v45  ;;  %v789_v51 = vpop.eup %788  ;;  %v317_v53 = vadd.f32 1.0, %v787_v48 }
 0x110   :  { %v791_v52 = vpop.eup %790  ;;  %v319_v57 = vadd.f32 1.0, %v789_v51 }
 0x111   :  { %730 = vmatprep.mubr.bf16.mxu1 %v357_v50  ;;  %v320_v56 = vadd.f32 1.0, %v791_v52  ;;  %v333_v59 = vmul.f32 0.5, %v317_v53 }
 0x112   :  { %v793_v55 = vpop.eup %792  ;;  %v335_v62 = vmul.f32 0.5, %v319_v57 }
 0x113   :  { %v318_v58 = vadd.f32 1.0, %v793_v55  ;;  %731 = vmatmul.mubr.bf16.gmra.mxu1 %v358_v54  ;;  %v336_v60 = vmul.f32 0.5, %v320_v56 }
 0x115   :  { %v334_v61 = vmul.f32 0.5, %v318_v58  ;;  %v360_v0 = vpack.c.bf16 %v336_v60, %v335_v62 }
 0x117   :  { %v359_v63 = vpack.c.bf16 %v334_v61, %v333_v59 }
 0x119   :  { %734 = vmatprep.mubr.bf16.mxu1 %v359_v63 }
 0x11b   :  { %735 = vmatmul.mubr.bf16.gmra.mxu1 %v360_v0 }
 0x1c3   :  { %v724_v2 = vpop.f32.mrf.mxu1 }
 0x1c4   :  { %v582_v3 = vadd.f32 %v724_v2, %v641_v1 }
 0x1c5   :  { %v459_v4 = vpop.f32.mrf.mxu1 }
 0x1c6   :  { %598 = vst [vmem:[%s973_s5 + $0x10] sm:$0xff] %v582_v3  ;;  %v580_v5 = vadd.f32 %v641_v1, %v459_v4 }
 0x1c7   :  { %v725_v6 = vpop.f32.mrf.mxu1 }
 0x1c8   :  { %596 = vst [vmem:[%s973_s5] sm:$0xff] %v580_v5  ;;  %v583_v7 = vadd.f32 %v725_v6, %v641_v1 }
 0x1c9   :  { %v462_v8 = vpop.f32.mrf.mxu1 }
 0x1ca   :  { %599 = vst [vmem:[%s973_s5 + $0x18] sm:$0xff] %v583_v7  ;;  %v581_v9 = vadd.f32 %v641_v1, %v462_v8 }
 0x1cb   :  { %v728_v10 = vpop.f32.mrf.mxu1 }
 0x1cc   :  { %597 = vst [vmem:[%s973_s5 + $0x8] sm:$0xff] %v581_v9  ;;  %v586_v11 = vadd.f32 %v728_v10, %v641_v1 }
 0x1cd   :  { %v475_v12 = vpop.f32.mrf.mxu1 }
 0x1ce   :  { %602 = vst [vmem:[%s973_s5 + $0x30] sm:$0xff] %v586_v11  ;;  %v584_v13 = vadd.f32 %v641_v1, %v475_v12 }
 0x1cf   :  { %v729_v14 = vpop.f32.mrf.mxu1 }
 0x1d0   :  { %600 = vst [vmem:[%s973_s5 + $0x20] sm:$0xff] %v584_v13  ;;  %v587_v15 = vadd.f32 %v729_v14, %v641_v1 }
 0x1d1   :  { %v478_v16 = vpop.f32.mrf.mxu1 }
 0x1d2   :  { %603 = vst [vmem:[%s973_s5 + $0x38] sm:$0xff] %v587_v15  ;;  %v585_v17 = vadd.f32 %v641_v1, %v478_v16 }
 0x1d3   :  { %v732_v18 = vpop.f32.mrf.mxu1 }
 0x1d4   :  { %601 = vst [vmem:[%s973_s5 + $0x28] sm:$0xff] %v585_v17  ;;  %v590_v19 = vadd.f32 %v732_v18, %v641_v1 }
 0x1d5   :  { %v491_v20 = vpop.f32.mrf.mxu1 }
 0x1d6   :  { %606 = vst [vmem:[%s973_s5 + $0x50] sm:$0xff] %v590_v19  ;;  %v588_v21 = vadd.f32 %v641_v1, %v491_v20 }
 0x1d7   :  { %v733_v22 = vpop.f32.mrf.mxu1 }
 0x1d8   :  { %604 = vst [vmem:[%s973_s5 + $0x40] sm:$0xff] %v588_v21  ;;  %v591_v23 = vadd.f32 %v733_v22, %v641_v1 }
 0x1d9   :  { %v494_v25 = vpop.f32.mrf.mxu1 }
 0x1da   :  { %607 = vst [vmem:[%s973_s5 + $0x58] sm:$0xff] %v591_v23  ;;  %v589_v26 = vadd.f32 %v641_v1, %v494_v25 }
 0x1db   :  { %v736_v27 = vpop.f32.mrf.mxu1 }
 0x1dc   :  { %605 = vst [vmem:[%s973_s5 + $0x48] sm:$0xff] %v589_v26  ;;  %v594_v28 = vadd.f32 %v736_v27, %v641_v1 }
 0x1dd   :  { %v507_v29 = vpop.f32.mrf.mxu1 }
 0x1de   :  { %610 = vst [vmem:[%s973_s5 + $0x70] sm:$0xff] %v594_v28  ;;  %v592_v30 = vadd.f32 %v641_v1, %v507_v29 }
 0x1df   :  { %v737_v31 = vpop.f32.mrf.mxu1 }
 0x1e0   :  { %608 = vst [vmem:[%s973_s5 + $0x60] sm:$0xff] %v592_v30  ;;  %v595_v32 = vadd.f32 %v737_v31, %v641_v1 }
 0x1e1   :  { %v510_v33 = vpop.f32.mrf.mxu1 }
 0x1e2   :  { %611 = vst [vmem:[%s973_s5 + $0x78] sm:$0xff] %v595_v32  ;;  %v593_v34 = vadd.f32 %v641_v1, %v510_v33 }
 0x1e4   :  { %609 = vst [vmem:[%s973_s5 + $0x68] sm:$0xff] %v593_v34 }

</bundles_post_ra>
